<compile_context>
chip_gen: v7x
topology: tpu7x:2x2x1
jax: 0.10.0
libtpu: 0.0.40
codegen_flags: <defaults>
</compile_context>

<pallas_src>
import math
import functools

import jax
import jax.numpy as jnp
import numpy as np
from jax import lax
from jax.experimental import pallas as pl
from jax.experimental.pallas import tpu as pltpu

# ---------------- model hyper-parameters (small, synthetic) ----------------
L = 8        # sequence length
B = 2        # batch
D = 32       # d_model
H = 2        # n_head
DK = 8       # d_k
DV = 8       # d_v
EPS = 1e-6

NQK = H * DK                 # 16  (Wq / Wk output width)
NV = H * DV                  # 16  (Wv output width)
PAR_QKV = 2 * NQK + NV       # 48  (Wq | Wk | Wv columns)
PAR_COLS = PAR_QKV + D       # 80  (+ tail block: Wfc rows 0:NV, vectors rows NV:NV+5)


# ------------------------------- kernel ------------------------------------
def _attn_kernel(act_ref, par_ref, out_ref, attn_ref, ctx_ref,
                 *, n_head, d_k, d_v, seq_len, batch, d_model):
    act = act_ref[...]                          # (B*L, 3*D), batch-major rows
    x = act[:, :d_model]                        # q slab -> outer residual
    kx = act[:, d_model:2 * d_model]
    vx = act[:, 2 * d_model:3 * d_model]

    par = par_ref[...]                          # (D, PAR_COLS) packed parameter slab
    nqk = n_head * d_k
    nv = n_head * d_v
    w_q = par[:, :nqk]                          # Wq pre-scaled by 1/sqrt(d_k)
    w_k = par[:, nqk:2 * nqk]
    w_v = par[:, 2 * nqk:2 * nqk + nv]
    tail = par[:, 2 * nqk + nv:]                # (D, D)
    w_fc = tail[:nv, :]                         # (H*DV, D)
    bfc = tail[nv + 0:nv + 1, :]
    g1 = tail[nv + 1:nv + 2, :]
    b1 = tail[nv + 2:nv + 3, :]
    g2 = tail[nv + 3:nv + 4, :]
    b2 = tail[nv + 4:nv + 5, :]

    def layer_norm(t, g, b):
        mu = jnp.mean(t, axis=-1, keepdims=True)
        var = jnp.mean(jnp.square(t - mu), axis=-1, keepdims=True)
        return (t - mu) * lax.rsqrt(var + EPS) * g + b

    # EfficientAttnLayer pre-norm, then MultiHeadAttention pre-norm (q only).
    xq1 = layer_norm(x, g1, b1)                 # inner residual
    xq2 = layer_norm(xq1, g2, b2)

    # Fused projections: 3 wide matmuls (all heads at once).
    proj_q = jnp.dot(xq2, w_q, preferred_element_type=jnp.float32)   # (B*L, H*DK)
    proj_k = jnp.dot(kx, w_k, preferred_element_type=jnp.float32)    # (B*L, H*DK)
    proj_v = jnp.dot(vx, w_v, preferred_element_type=jnp.float32)    # (B*L, H*DV)

    # Attention core: static (batch, head) unroll over tiny (L, L) tiles.
    # attn tiles are slice-stored straight into the lane-dense attn output;
    # ctx tiles are slice-stored into a VMEM scratch feeding ONE fc matmul.
    for b in range(batch):
        r0 = b * seq_len
        q_b = proj_q[r0:r0 + seq_len]           # (L, H*DK)
        k_b = proj_k[r0:r0 + seq_len]
        v_b = proj_v[r0:r0 + seq_len]
        for h in range(n_head):
            qh = q_b[:, h * d_k:(h + 1) * d_k]  # (L, DK); scale folded into Wq
            kh = k_b[:, h * d_k:(h + 1) * d_k]
            vh = v_b[:, h * d_v:(h + 1) * d_v]
            s = lax.dot_general(qh, kh, (((1,), (1,)), ((), ())),
                                preferred_element_type=jnp.float32)   # (L, L)
            m = jnp.max(s, axis=-1, keepdims=True)
            p = jnp.exp(s - m)
            # Exact divide: attn is a user-visible output; rows must sum to 1.
            attn = p / jnp.sum(p, axis=-1, keepdims=True)
            attn_ref[:, pl.ds((b * n_head + h) * seq_len, seq_len)] = attn
            ctx_ref[pl.ds(r0, seq_len), pl.ds(h * d_v, d_v)] = jnp.dot(
                attn, vh, preferred_element_type=jnp.float32)

    # Single output projection + fc bias + inner residual + outer residual.
    out_ref[...] = (jnp.dot(ctx_ref[...], w_fc, preferred_element_type=jnp.float32)
                    + bfc + xq1 + x)


# ------------------------------- wrapper ------------------------------------
def pack_params(params):
    """One-time packing of all weights/vectors into a single (D, PAR_COLS) slab.

    Columns 0:48   = [Wq * 1/sqrt(d_k) | Wk | Wv]
    Columns 48:80  = tail block: rows 0:16 = Wfc, rows 16:21 = [bfc; g1; b1; g2; b2].
    Call once at init (hoisted out of the per-call forward path).
    """
    wq_scaled = params["wq"] * jnp.float32(1.0 / math.sqrt(DK))
    tail = jnp.zeros((D, D), jnp.float32)
    tail = tail.at[:NV, :].set(params["wfc"])
    tail = tail.at[NV + 0, :].set(params["bfc"])
    tail = tail.at[NV + 1, :].set(params["g1"])
    tail = tail.at[NV + 2, :].set(params["b1"])
    tail = tail.at[NV + 3, :].set(params["g2"])
    tail = tail.at[NV + 4, :].set(params["b2"])
    return jnp.concatenate([wq_scaled, params["wk"], params["wv"], tail], axis=1)


@jax.jit
def efficient_attn_layer(q, k, v, packed_params):
    """q, k, v: (L, B, D) float32; packed_params: (D, PAR_COLS) from pack_params.

    Returns (output (L, B, D), attn (B, H, L, L))."""
    # (L, B, D) -> batch-major rows; single lane-concatenated activation slab.
    qt = jnp.swapaxes(q, 0, 1).reshape(B * L, D)
    kt = jnp.swapaxes(k, 0, 1).reshape(B * L, D)
    vt = jnp.swapaxes(v, 0, 1).reshape(B * L, D)
    act = jnp.concatenate([qt, kt, vt], axis=1)               # (B*L, 3*D) = (16, 96)

    kernel = functools.partial(_attn_kernel, n_head=H, d_k=DK, d_v=DV,
                               seq_len=L, batch=B, d_model=D)

    out_slab, attn_slab = pl.pallas_call(
        kernel,
        out_shape=(
            jax.ShapeDtypeStruct((B * L, D), jnp.float32),     # output slab (16, 32)
            jax.ShapeDtypeStruct((L, B * H * L), jnp.float32), # lane-dense attn (8, 32)
        ),
        grid_spec=pltpu.PrefetchScalarGridSpec(
            num_scalar_prefetch=0,
            grid=(1,),                    # whole problem in one grid step
            in_specs=[
                pl.BlockSpec((B * L, 3 * D), lambda i: (0, 0)),
                pl.BlockSpec((D, PAR_COLS), lambda i: (0, 0)),
            ],
            out_specs=[
                pl.BlockSpec((B * L, D), lambda i: (0, 0)),
                pl.BlockSpec((L, B * H * L), lambda i: (0, 0)),
            ],
            scratch_shapes=[pltpu.VMEM((B * L, H * DV), jnp.float32)],  # ctx scratch
        ),
        compiler_params=pltpu.CompilerParams(
            dimension_semantics=("arbitrary",)),
    )(act, packed_params)

    out = jnp.swapaxes(out_slab.reshape(B, L, D), 0, 1)            # (L, B, D)
    attn = attn_slab.reshape(L, B, H, L).transpose(1, 2, 0, 3)     # (B, H, L, L)
    return out, attn


# --------------------------- pure-JAX reference ------------------------------
def reference(q, k, v, params):
    qt = jnp.swapaxes(q, 0, 1)
    kt = jnp.swapaxes(k, 0, 1)
    vt = jnp.swapaxes(v, 0, 1)

    def layer_norm(x, g, b):
        mu = x.mean(-1, keepdims=True)
        var = ((x - mu) ** 2).mean(-1, keepdims=True)
        return (x - mu) / jnp.sqrt(var + EPS) * g + b

    qn1 = layer_norm(qt, params["g1"], params["b1"])
    qn2 = layer_norm(qn1, params["g2"], params["b2"])

    Q = (qn2 @ params["wq"]).reshape(B, L, H, DK).transpose(0, 2, 1, 3)
    K = (kt @ params["wk"]).reshape(B, L, H, DK).transpose(0, 2, 1, 3)
    V = (vt @ params["wv"]).reshape(B, L, H, DV).transpose(0, 2, 1, 3)

    s = jnp.einsum("bhqd,bhkd->bhqk", Q, K) / math.sqrt(DK)
    attn = jax.nn.softmax(s, axis=-1)
    ctx = jnp.einsum("bhqk,bhkd->bhqd", attn, V).transpose(0, 2, 1, 3).reshape(B, L, H * DV)
    out = ctx @ params["wfc"] + params["bfc"]
    out = out + qn1
    out = jnp.swapaxes(out, 0, 1) + q
    return out, attn


# ------------------------------------ main -----------------------------------
if __name__ == "__main__":
    key = jax.random.PRNGKey(0)
    keys = jax.random.split(key, 8)

    def xavier(key, shape):
        fan_in, fan_out = shape
        a = math.sqrt(6.0 / (fan_in + fan_out))
        return jax.random.uniform(key, shape, jnp.float32, -a, a)

    params = {
        # stored already-transposed: y = x @ W  (== torch x @ W^T)
        "wq": xavier(keys[0], (D, H * DK)),
        "wk": xavier(keys[1], (D, H * DK)),
        "wv": xavier(keys[2], (D, H * DV)),
        "wfc": xavier(keys[3], (H * DV, D)),
        "bfc": jax.random.uniform(keys[4], (D,), jnp.float32,
                                  -1.0 / math.sqrt(H * DV), 1.0 / math.sqrt(H * DV)),
        # LayerNorm params (torch default init)
        "g1": jnp.ones((D,), jnp.float32),
        "b1": jnp.zeros((D,), jnp.float32),
        "g2": jnp.ones((D,), jnp.float32),
        "b2": jnp.zeros((D,), jnp.float32),
    }

    # One-time parameter packing (hoisted out of the per-call forward path).
    packed_params = jax.block_until_ready(pack_params(params))

    q = jax.random.normal(keys[5], (L, B, D), jnp.float32)
    k = jax.random.normal(keys[6], (L, B, D), jnp.float32)
    v = jax.random.normal(keys[7], (L, B, D), jnp.float32)

    out, attn = efficient_attn_layer(q, k, v, packed_params)
    out = jax.block_until_ready(out)
    attn = jax.block_until_ready(attn)

    out_ref, attn_ref = reference(q, k, v, params)
    # Softmax normalization is exact in the kernel; remaining tolerance covers
    # MXU f32->bf16-pass decomposition differences between the Pallas dots and
    # the XLA default-precision reference matmuls.
    np.testing.assert_allclose(np.asarray(out), np.asarray(out_ref), rtol=2e-3, atol=2e-3)
    np.testing.assert_allclose(np.asarray(attn), np.asarray(attn_ref), rtol=2e-3, atol=2e-3)

    print("KERNEL_OK")
</pallas_src>

<mosaic_0001>
module attributes {stable_mosaic.version = 11 : i64} {
  func.func @_attn_kernel(%arg0: i32, %arg1: memref<16x96xf32, #tpu.memory_space<vmem>>, %arg2: memref<32x80xf32, #tpu.memory_space<vmem>>, %arg3: memref<16x32xf32, #tpu.memory_space<vmem>>, %arg4: memref<8x32xf32, #tpu.memory_space<vmem>>, %arg5: memref<16x16xf32, #tpu.memory_space<vmem>>) attributes {dimension_semantics = [#tpu.dimension_semantics<arbitrary>], iteration_bounds = array<i64: 1>, scalar_prefetch = 0 : i64, scratch_operands = 1 : i64, tpu.core_type = #tpu.core_type<tc>, window_params = [{pipeline_mode = #tpu.pipeline_mode<synchronous>, transform_indices = @transform_0, window_bounds = array<i64: 16, 96>}, {pipeline_mode = #tpu.pipeline_mode<synchronous>, transform_indices = @transform_1, window_bounds = array<i64: 32, 80>}, {pipeline_mode = #tpu.pipeline_mode<synchronous>, transform_indices = @transform_2, window_bounds = array<i64: 16, 32>}, {pipeline_mode = #tpu.pipeline_mode<synchronous>, transform_indices = @transform_3, window_bounds = array<i64: 8, 32>}]} {
    %c0 = arith.constant 0 : index
    %c0_0 = arith.constant 0 : index
    %0 = vector.load %arg1[%c0, %c0_0] : memref<16x96xf32, #tpu.memory_space<vmem>>, vector<16x96xf32>
    %1 = vector.extract_strided_slice %0 {offsets = [0, 0], sizes = [16, 32], strides = [1, 1]} : vector<16x96xf32> to vector<16x32xf32>
    %2 = vector.extract_strided_slice %0 {offsets = [0, 32], sizes = [16, 32], strides = [1, 1]} : vector<16x96xf32> to vector<16x32xf32>
    %3 = vector.extract_strided_slice %0 {offsets = [0, 64], sizes = [16, 32], strides = [1, 1]} : vector<16x96xf32> to vector<16x32xf32>
    %c0_1 = arith.constant 0 : index
    %c0_2 = arith.constant 0 : index
    %4 = vector.load %arg2[%c0_1, %c0_2] : memref<32x80xf32, #tpu.memory_space<vmem>>, vector<32x80xf32>
    %5 = vector.extract_strided_slice %4 {offsets = [0, 0], sizes = [32, 16], strides = [1, 1]} : vector<32x80xf32> to vector<32x16xf32>
    %6 = vector.extract_strided_slice %4 {offsets = [0, 16], sizes = [32, 16], strides = [1, 1]} : vector<32x80xf32> to vector<32x16xf32>
    %7 = vector.extract_strided_slice %4 {offsets = [0, 32], sizes = [32, 16], strides = [1, 1]} : vector<32x80xf32> to vector<32x16xf32>
    %8 = vector.extract_strided_slice %4 {offsets = [0, 48], sizes = [32, 32], strides = [1, 1]} : vector<32x80xf32> to vector<32x32xf32>
    %9 = vector.extract_strided_slice %8 {offsets = [0, 0], sizes = [16, 32], strides = [1, 1]} : vector<32x32xf32> to vector<16x32xf32>
    %10 = vector.extract_strided_slice %8 {offsets = [16, 0], sizes = [1, 32], strides = [1, 1]} : vector<32x32xf32> to vector<1x32xf32>
    %11 = vector.extract_strided_slice %8 {offsets = [17, 0], sizes = [1, 32], strides = [1, 1]} : vector<32x32xf32> to vector<1x32xf32>
    %12 = vector.extract_strided_slice %8 {offsets = [18, 0], sizes = [1, 32], strides = [1, 1]} : vector<32x32xf32> to vector<1x32xf32>
    %13 = vector.extract_strided_slice %8 {offsets = [19, 0], sizes = [1, 32], strides = [1, 1]} : vector<32x32xf32> to vector<1x32xf32>
    %14 = vector.extract_strided_slice %8 {offsets = [20, 0], sizes = [1, 32], strides = [1, 1]} : vector<32x32xf32> to vector<1x32xf32>
    %cst = arith.constant dense<0.000000e+00> : vector<16xf32>
    %15 = vector.multi_reduction <add>, %1, %cst [1] : vector<16x32xf32> to vector<16xf32>
    %16 = vector.shape_cast %15 : vector<16xf32> to vector<16x1xf32>
    %cst_3 = arith.constant 3.200000e+01 : f32
    %17 = vector.broadcast %cst_3 : f32 to vector<16x1xf32>
    %18 = arith.divf %16, %17 : vector<16x1xf32>
    %19 = vector.broadcast %18 : vector<16x1xf32> to vector<16x32xf32>
    %20 = arith.subf %1, %19 : vector<16x32xf32>
    %21 = arith.mulf %20, %20 : vector<16x32xf32>
    %cst_4 = arith.constant dense<0.000000e+00> : vector<16xf32>
    %22 = vector.multi_reduction <add>, %21, %cst_4 [1] : vector<16x32xf32> to vector<16xf32>
    %23 = vector.shape_cast %22 : vector<16xf32> to vector<16x1xf32>
    %cst_5 = arith.constant 3.200000e+01 : f32
    %24 = vector.broadcast %cst_5 : f32 to vector<16x1xf32>
    %25 = arith.divf %23, %24 : vector<16x1xf32>
    %26 = vector.broadcast %18 : vector<16x1xf32> to vector<16x32xf32>
    %27 = arith.subf %1, %26 : vector<16x32xf32>
    %cst_6 = arith.constant 9.99999997E-7 : f32
    %28 = vector.broadcast %cst_6 : f32 to vector<16x1xf32>
    %29 = arith.addf %25, %28 : vector<16x1xf32>
    %30 = math.rsqrt %29 : vector<16x1xf32>
    %31 = vector.broadcast %30 : vector<16x1xf32> to vector<16x32xf32>
    %32 = arith.mulf %27, %31 : vector<16x32xf32>
    %33 = vector.broadcast %11 : vector<1x32xf32> to vector<16x32xf32>
    %34 = arith.mulf %32, %33 : vector<16x32xf32>
    %35 = vector.broadcast %12 : vector<1x32xf32> to vector<16x32xf32>
    %36 = arith.addf %34, %35 : vector<16x32xf32>
    %cst_7 = arith.constant dense<0.000000e+00> : vector<16xf32>
    %37 = vector.multi_reduction <add>, %36, %cst_7 [1] : vector<16x32xf32> to vector<16xf32>
    %38 = vector.shape_cast %37 : vector<16xf32> to vector<16x1xf32>
    %cst_8 = arith.constant 3.200000e+01 : f32
    %39 = vector.broadcast %cst_8 : f32 to vector<16x1xf32>
    %40 = arith.divf %38, %39 : vector<16x1xf32>
    %41 = vector.broadcast %40 : vector<16x1xf32> to vector<16x32xf32>
    %42 = arith.subf %36, %41 : vector<16x32xf32>
    %43 = arith.mulf %42, %42 : vector<16x32xf32>
    %cst_9 = arith.constant dense<0.000000e+00> : vector<16xf32>
    %44 = vector.multi_reduction <add>, %43, %cst_9 [1] : vector<16x32xf32> to vector<16xf32>
    %45 = vector.shape_cast %44 : vector<16xf32> to vector<16x1xf32>
    %cst_10 = arith.constant 3.200000e+01 : f32
    %46 = vector.broadcast %cst_10 : f32 to vector<16x1xf32>
    %47 = arith.divf %45, %46 : vector<16x1xf32>
    %48 = vector.broadcast %40 : vector<16x1xf32> to vector<16x32xf32>
    %49 = arith.subf %36, %48 : vector<16x32xf32>
    %cst_11 = arith.constant 9.99999997E-7 : f32
    %50 = vector.broadcast %cst_11 : f32 to vector<16x1xf32>
    %51 = arith.addf %47, %50 : vector<16x1xf32>
    %52 = math.rsqrt %51 : vector<16x1xf32>
    %53 = vector.broadcast %52 : vector<16x1xf32> to vector<16x32xf32>
    %54 = arith.mulf %49, %53 : vector<16x32xf32>
    %55 = vector.broadcast %13 : vector<1x32xf32> to vector<16x32xf32>
    %56 = arith.mulf %54, %55 : vector<16x32xf32>
    %57 = vector.broadcast %14 : vector<1x32xf32> to vector<16x32xf32>
    %58 = arith.addf %56, %57 : vector<16x32xf32>
    %cst_12 = arith.constant dense<0.000000e+00> : vector<16x16xf32>
    %59 = tpu.matmul %58, %5, %cst_12 {dimension_numbers = #tpu.dot_dimension_numbers<[1], [0], [0], [1], [0, 0, 1, 1], [], []>} : vector<16x32xf32>, vector<32x16xf32>, vector<16x16xf32> -> vector<16x16xf32>
    %cst_13 = arith.constant dense<0.000000e+00> : vector<16x16xf32>
    %60 = tpu.matmul %2, %6, %cst_13 {dimension_numbers = #tpu.dot_dimension_numbers<[1], [0], [0], [1], [0, 0, 1, 1], [], []>} : vector<16x32xf32>, vector<32x16xf32>, vector<16x16xf32> -> vector<16x16xf32>
    %cst_14 = arith.constant dense<0.000000e+00> : vector<16x16xf32>
    %61 = tpu.matmul %3, %7, %cst_14 {dimension_numbers = #tpu.dot_dimension_numbers<[1], [0], [0], [1], [0, 0, 1, 1], [], []>} : vector<16x32xf32>, vector<32x16xf32>, vector<16x16xf32> -> vector<16x16xf32>
    %62 = vector.extract_strided_slice %59 {offsets = [0, 0], sizes = [8, 16], strides = [1, 1]} : vector<16x16xf32> to vector<8x16xf32>
    %63 = vector.extract_strided_slice %60 {offsets = [0, 0], sizes = [8, 16], strides = [1, 1]} : vector<16x16xf32> to vector<8x16xf32>
    %64 = vector.extract_strided_slice %61 {offsets = [0, 0], sizes = [8, 16], strides = [1, 1]} : vector<16x16xf32> to vector<8x16xf32>
    %65 = vector.extract_strided_slice %62 {offsets = [0, 0], sizes = [8, 8], strides = [1, 1]} : vector<8x16xf32> to vector<8x8xf32>
    %66 = vector.extract_strided_slice %63 {offsets = [0, 0], sizes = [8, 8], strides = [1, 1]} : vector<8x16xf32> to vector<8x8xf32>
    %67 = vector.extract_strided_slice %64 {offsets = [0, 0], sizes = [8, 8], strides = [1, 1]} : vector<8x16xf32> to vector<8x8xf32>
    %cst_15 = arith.constant dense<0.000000e+00> : vector<8x8xf32>
    %68 = tpu.matmul %65, %66, %cst_15 {dimension_numbers = #tpu.dot_dimension_numbers<[1], [1], [0], [0], [0, 0, 1, 0], [], []>} : vector<8x8xf32>, vector<8x8xf32>, vector<8x8xf32> -> vector<8x8xf32>
    %cst_16 = arith.constant dense<0xFF800000> : vector<8xf32>
    %69 = vector.multi_reduction <maximumf>, %68, %cst_16 [1] : vector<8x8xf32> to vector<8xf32>
    %70 = vector.shape_cast %69 : vector<8xf32> to vector<8x1xf32>
    %71 = vector.broadcast %70 : vector<8x1xf32> to vector<8x8xf32>
    %72 = arith.subf %68, %71 : vector<8x8xf32>
    %73 = math.exp %72 : vector<8x8xf32>
    %cst_17 = arith.constant dense<0.000000e+00> : vector<8xf32>
    %74 = vector.multi_reduction <add>, %73, %cst_17 [1] : vector<8x8xf32> to vector<8xf32>
    %75 = vector.shape_cast %74 : vector<8xf32> to vector<8x1xf32>
    %76 = vector.broadcast %75 : vector<8x1xf32> to vector<8x8xf32>
    %77 = arith.divf %73, %76 : vector<8x8xf32>
    %c0_18 = arith.constant 0 : index
    %c0_19 = arith.constant 0 : index
    %78 = vector.load %arg4[%c0_18, %c0_19] : memref<8x32xf32, #tpu.memory_space<vmem>>, vector<8x8xf32>
    tpu.vector_store %arg4[%c0_18, %c0_19], %77 {strides = array<i32>} : memref<8x32xf32, #tpu.memory_space<vmem>>, vector<8x8xf32>,
    %cst_20 = arith.constant dense<0.000000e+00> : vector<8x8xf32>
    %79 = tpu.matmul %77, %67, %cst_20 {dimension_numbers = #tpu.dot_dimension_numbers<[1], [0], [0], [1], [0, 0, 1, 1], [], []>} : vector<8x8xf32>, vector<8x8xf32>, vector<8x8xf32> -> vector<8x8xf32>
    %c0_21 = arith.constant 0 : index
    %c0_22 = arith.constant 0 : index
    %80 = vector.load %arg5[%c0_21, %c0_22] : memref<16x16xf32, #tpu.memory_space<vmem>>, vector<8x8xf32>
    tpu.vector_store %arg5[%c0_21, %c0_22], %79 {strides = array<i32>} : memref<16x16xf32, #tpu.memory_space<vmem>>, vector<8x8xf32>,
    %81 = vector.extract_strided_slice %62 {offsets = [0, 8], sizes = [8, 8], strides = [1, 1]} : vector<8x16xf32> to vector<8x8xf32>
    %82 = vector.extract_strided_slice %63 {offsets = [0, 8], sizes = [8, 8], strides = [1, 1]} : vector<8x16xf32> to vector<8x8xf32>
    %83 = vector.extract_strided_slice %64 {offsets = [0, 8], sizes = [8, 8], strides = [1, 1]} : vector<8x16xf32> to vector<8x8xf32>
    %cst_23 = arith.constant dense<0.000000e+00> : vector<8x8xf32>
    %84 = tpu.matmul %81, %82, %cst_23 {dimension_numbers = #tpu.dot_dimension_numbers<[1], [1], [0], [0], [0, 0, 1, 0], [], []>} : vector<8x8xf32>, vector<8x8xf32>, vector<8x8xf32> -> vector<8x8xf32>
    %cst_24 = arith.constant dense<0xFF800000> : vector<8xf32>
    %85 = vector.multi_reduction <maximumf>, %84, %cst_24 [1] : vector<8x8xf32> to vector<8xf32>
    %86 = vector.shape_cast %85 : vector<8xf32> to vector<8x1xf32>
    %87 = vector.broadcast %86 : vector<8x1xf32> to vector<8x8xf32>
    %88 = arith.subf %84, %87 : vector<8x8xf32>
    %89 = math.exp %88 : vector<8x8xf32>
    %cst_25 = arith.constant dense<0.000000e+00> : vector<8xf32>
    %90 = vector.multi_reduction <add>, %89, %cst_25 [1] : vector<8x8xf32> to vector<8xf32>
    %91 = vector.shape_cast %90 : vector<8xf32> to vector<8x1xf32>
    %92 = vector.broadcast %91 : vector<8x1xf32> to vector<8x8xf32>
    %93 = arith.divf %89, %92 : vector<8x8xf32>
    %c0_26 = arith.constant 0 : index
    %c8 = arith.constant 8 : index
    %94 = vector.load %arg4[%c0_26, %c8] : memref<8x32xf32, #tpu.memory_space<vmem>>, vector<8x8xf32>
    tpu.vector_store %arg4[%c0_26, %c8], %93 {strides = array<i32>} : memref<8x32xf32, #tpu.memory_space<vmem>>, vector<8x8xf32>,
    %cst_27 = arith.constant dense<0.000000e+00> : vector<8x8xf32>
    %95 = tpu.matmul %93, %83, %cst_27 {dimension_numbers = #tpu.dot_dimension_numbers<[1], [0], [0], [1], [0, 0, 1, 1], [], []>} : vector<8x8xf32>, vector<8x8xf32>, vector<8x8xf32> -> vector<8x8xf32>
    %c0_28 = arith.constant 0 : index
    %c8_29 = arith.constant 8 : index
    %96 = vector.load %arg5[%c0_28, %c8_29] : memref<16x16xf32, #tpu.memory_space<vmem>>, vector<8x8xf32>
    tpu.vector_store %arg5[%c0_28, %c8_29], %95 {strides = array<i32>} : memref<16x16xf32, #tpu.memory_space<vmem>>, vector<8x8xf32>,
    %97 = vector.extract_strided_slice %59 {offsets = [8, 0], sizes = [8, 16], strides = [1, 1]} : vector<16x16xf32> to vector<8x16xf32>
    %98 = vector.extract_strided_slice %60 {offsets = [8, 0], sizes = [8, 16], strides = [1, 1]} : vector<16x16xf32> to vector<8x16xf32>
    %99 = vector.extract_strided_slice %61 {offsets = [8, 0], sizes = [8, 16], strides = [1, 1]} : vector<16x16xf32> to vector<8x16xf32>
    %100 = vector.extract_strided_slice %97 {offsets = [0, 0], sizes = [8, 8], strides = [1, 1]} : vector<8x16xf32> to vector<8x8xf32>
    %101 = vector.extract_strided_slice %98 {offsets = [0, 0], sizes = [8, 8], strides = [1, 1]} : vector<8x16xf32> to vector<8x8xf32>
    %102 = vector.extract_strided_slice %99 {offsets = [0, 0], sizes = [8, 8], strides = [1, 1]} : vector<8x16xf32> to vector<8x8xf32>
    %cst_30 = arith.constant dense<0.000000e+00> : vector<8x8xf32>
    %103 = tpu.matmul %100, %101, %cst_30 {dimension_numbers = #tpu.dot_dimension_numbers<[1], [1], [0], [0], [0, 0, 1, 0], [], []>} : vector<8x8xf32>, vector<8x8xf32>, vector<8x8xf32> -> vector<8x8xf32>
    %cst_31 = arith.constant dense<0xFF800000> : vector<8xf32>
    %104 = vector.multi_reduction <maximumf>, %103, %cst_31 [1] : vector<8x8xf32> to vector<8xf32>
    %105 = vector.shape_cast %104 : vector<8xf32> to vector<8x1xf32>
    %106 = vector.broadcast %105 : vector<8x1xf32> to vector<8x8xf32>
    %107 = arith.subf %103, %106 : vector<8x8xf32>
    %108 = math.exp %107 : vector<8x8xf32>
    %cst_32 = arith.constant dense<0.000000e+00> : vector<8xf32>
    %109 = vector.multi_reduction <add>, %108, %cst_32 [1] : vector<8x8xf32> to vector<8xf32>
    %110 = vector.shape_cast %109 : vector<8xf32> to vector<8x1xf32>
    %111 = vector.broadcast %110 : vector<8x1xf32> to vector<8x8xf32>
    %112 = arith.divf %108, %111 : vector<8x8xf32>
    %c0_33 = arith.constant 0 : index
    %c16 = arith.constant 16 : index
    %113 = vector.load %arg4[%c0_33, %c16] : memref<8x32xf32, #tpu.memory_space<vmem>>, vector<8x8xf32>
    tpu.vector_store %arg4[%c0_33, %c16], %112 {strides = array<i32>} : memref<8x32xf32, #tpu.memory_space<vmem>>, vector<8x8xf32>,
    %cst_34 = arith.constant dense<0.000000e+00> : vector<8x8xf32>
    %114 = tpu.matmul %112, %102, %cst_34 {dimension_numbers = #tpu.dot_dimension_numbers<[1], [0], [0], [1], [0, 0, 1, 1], [], []>} : vector<8x8xf32>, vector<8x8xf32>, vector<8x8xf32> -> vector<8x8xf32>
    %c8_35 = arith.constant 8 : index
    %c0_36 = arith.constant 0 : index
    %115 = vector.load %arg5[%c8_35, %c0_36] : memref<16x16xf32, #tpu.memory_space<vmem>>, vector<8x8xf32>
    tpu.vector_store %arg5[%c8_35, %c0_36], %114 {strides = array<i32>} : memref<16x16xf32, #tpu.memory_space<vmem>>, vector<8x8xf32>,
    %116 = vector.extract_strided_slice %97 {offsets = [0, 8], sizes = [8, 8], strides = [1, 1]} : vector<8x16xf32> to vector<8x8xf32>
    %117 = vector.extract_strided_slice %98 {offsets = [0, 8], sizes = [8, 8], strides = [1, 1]} : vector<8x16xf32> to vector<8x8xf32>
    %118 = vector.extract_strided_slice %99 {offsets = [0, 8], sizes = [8, 8], strides = [1, 1]} : vector<8x16xf32> to vector<8x8xf32>
    %cst_37 = arith.constant dense<0.000000e+00> : vector<8x8xf32>
    %119 = tpu.matmul %116, %117, %cst_37 {dimension_numbers = #tpu.dot_dimension_numbers<[1], [1], [0], [0], [0, 0, 1, 0], [], []>} : vector<8x8xf32>, vector<8x8xf32>, vector<8x8xf32> -> vector<8x8xf32>
    %cst_38 = arith.constant dense<0xFF800000> : vector<8xf32>
    %120 = vector.multi_reduction <maximumf>, %119, %cst_38 [1] : vector<8x8xf32> to vector<8xf32>
    %121 = vector.shape_cast %120 : vector<8xf32> to vector<8x1xf32>
    %122 = vector.broadcast %121 : vector<8x1xf32> to vector<8x8xf32>
    %123 = arith.subf %119, %122 : vector<8x8xf32>
    %124 = math.exp %123 : vector<8x8xf32>
    %cst_39 = arith.constant dense<0.000000e+00> : vector<8xf32>
    %125 = vector.multi_reduction <add>, %124, %cst_39 [1] : vector<8x8xf32> to vector<8xf32>
    %126 = vector.shape_cast %125 : vector<8xf32> to vector<8x1xf32>
    %127 = vector.broadcast %126 : vector<8x1xf32> to vector<8x8xf32>
    %128 = arith.divf %124, %127 : vector<8x8xf32>
    %c0_40 = arith.constant 0 : index
    %c24 = arith.constant 24 : index
    %129 = vector.load %arg4[%c0_40, %c24] : memref<8x32xf32, #tpu.memory_space<vmem>>, vector<8x8xf32>
    tpu.vector_store %arg4[%c0_40, %c24], %128 {strides = array<i32>} : memref<8x32xf32, #tpu.memory_space<vmem>>, vector<8x8xf32>,
    %cst_41 = arith.constant dense<0.000000e+00> : vector<8x8xf32>
    %130 = tpu.matmul %128, %118, %cst_41 {dimension_numbers = #tpu.dot_dimension_numbers<[1], [0], [0], [1], [0, 0, 1, 1], [], []>} : vector<8x8xf32>, vector<8x8xf32>, vector<8x8xf32> -> vector<8x8xf32>
    %c8_42 = arith.constant 8 : index
    %c8_43 = arith.constant 8 : index
    %131 = vector.load %arg5[%c8_42, %c8_43] : memref<16x16xf32, #tpu.memory_space<vmem>>, vector<8x8xf32>
    tpu.vector_store %arg5[%c8_42, %c8_43], %130 {strides = array<i32>} : memref<16x16xf32, #tpu.memory_space<vmem>>, vector<8x8xf32>,
    %c0_44 = arith.constant 0 : index
    %c0_45 = arith.constant 0 : index
    %132 = vector.load %arg5[%c0_44, %c0_45] : memref<16x16xf32, #tpu.memory_space<vmem>>, vector<16x16xf32>
    %cst_46 = arith.constant dense<0.000000e+00> : vector<16x32xf32>
    %133 = tpu.matmul %132, %9, %cst_46 {dimension_numbers = #tpu.dot_dimension_numbers<[1], [0], [0], [1], [0, 0, 1, 1], [], []>} : vector<16x16xf32>, vector<16x32xf32>, vector<16x32xf32> -> vector<16x32xf32>
    %134 = vector.broadcast %10 : vector<1x32xf32> to vector<16x32xf32>
    %135 = arith.addf %133, %134 : vector<16x32xf32>
    %136 = arith.addf %135, %36 : vector<16x32xf32>
    %137 = arith.addf %136, %1 : vector<16x32xf32>
    %c0_47 = arith.constant 0 : index
    %c0_48 = arith.constant 0 : index
    %138 = vector.load %arg3[%c0_47, %c0_48] : memref<16x32xf32, #tpu.memory_space<vmem>>, vector<16x32xf32>
    tpu.vector_store %arg3[%c0_47, %c0_48], %137 {strides = array<i32>} : memref<16x32xf32, #tpu.memory_space<vmem>>, vector<16x32xf32>,
    return
  }
  func.func @transform_0(%arg0: i32) -> (i32, i32) {
    %c0_i32 = arith.constant 0 : i32
    %c0_i32_0 = arith.constant 0 : i32
    %c0_i32_1 = arith.constant 0 : i32
    return %c0_i32, %c0_i32_0 : i32, i32
  }
  func.func @transform_1(%arg0: i32) -> (i32, i32) {
    %c0_i32 = arith.constant 0 : i32
    %c0_i32_0 = arith.constant 0 : i32
    %c0_i32_1 = arith.constant 0 : i32
    return %c0_i32, %c0_i32_0 : i32, i32
  }
  func.func @transform_2(%arg0: i32) -> (i32, i32) {
    %c0_i32 = arith.constant 0 : i32
    %c0_i32_0 = arith.constant 0 : i32
    %c0_i32_1 = arith.constant 0 : i32
    return %c0_i32, %c0_i32_0 : i32, i32
  }
  func.func @transform_3(%arg0: i32) -> (i32, i32) {
    %c0_i32 = arith.constant 0 : i32
    %c0_i32_0 = arith.constant 0 : i32
    %c0_i32_1 = arith.constant 0 : i32
    return %c0_i32, %c0_i32_0 : i32, i32
  }
}

</mosaic_0001>

<bundles_post_ra>
// kernel: efficient_attn_layer.1
= control target key start
LH: loop header
LB: loop body
LE: loop exit
PB: predicated region body
PF: predicated region fallthrough
CT: control target
= control target key end

     0   :  { %vm19_vm0 = vcmask 261120   ;;  %v47_v4 = vlaneseq  ;;  %s1409_s20 = smov 112   ;;  %s1410_s21 = smov 96   ;;  %vm1413_vm1 = vmmov 0   ;;  %vm390_vm2 = vcmask 64512   ;;  %s1602_s0 = inlined_call_operand.vmem [shape: f32[16,96], index: 0, kind: input, shape index: {}]   ;;  %s1603_s1 = inlined_call_operand.vmem [shape: f32[32,80], index: 1, kind: input, shape index: {}]   ;;  %s1604_s3 = inlined_call_operand.vmem [shape: f32[8,32], index: 3, kind: output, shape index: {1}]   ;;  %s1605_s2 = inlined_call_operand.vmem [shape: f32[16,32], index: 2, kind: output, shape index: {0}]  }
   0x1   :  { %v1441_v0 = vld [vmem:[%s1602_s0] sm:$0xff]  ;;  %v1446_v1 = vld [vmem:[%s1602_s0 + $0x8] sm:$0xff]  ;;  %v1457_v6 = vld [vmem:[%s1603_s1 + $0x10] sm:$0xff]  ;;  %s1408_s0 = smov 80   ;;  %s1414_s26 = smov 120   ;;  %vm646_vm3 = vcmask 130112  }
   0x2   :  { %v20_v2 = vsel %vm19_vm0, %v1441_v0, 0.0  ;;  %v23_v3 = vsel %vm19_vm0, %v1446_v1, 0.0  ;;  %v1452_v5 = vshrl.u32 %v47_v4, 7  ;;  %v18_v39 = vld [vmem:[%s1603_s1 + $0x18] sm:$0xff]  ;;  %v15_v56 = vld [vmem:[%s1603_s1] sm:$0xff]  ;;  %v16_v57 = vld [vmem:[%s1603_s1 + $0x8] sm:$0xff] }
   0x3   :  { %21 = vadd.xlane.f32.xlu0 %v20_v2  ;;  %v1364_v40 = vpack.i.bf16 %v18_v39, %v1457_v6  ;;  %v1497_v58 = vpack.i.bf16 %v16_v57, %v15_v56  ;;  %v1321_v61 = vpack.c.bf16 %v16_v57, %v15_v56  ;;  %v1325_v62 = vpack.c.bf16 %v18_v39, %v1457_v6  ;;  %s1411_s1 = smov 64   ;;  %s1415_s29 = smov 16  }
   0x4   :  { %v49_v7 = vsub.s32 1, %v1452_v5  ;;  %v59_v19 = vsub.s32 2, %v1452_v5  ;;  %v95_v41 = vsub.s32 3, %v1452_v5  ;;  %v105_v59 = vsub.s32 4, %v1452_v5  ;;  %s1416_s30 = smov 8   ;;  %s1417_s4 = smov 24  }
   0x5   :  { %1322 = vmatprep.subr.bf16.mxu0 %v1321_v61  ;;  %vm1087_vm4 = vcmask 130048   ;;  %vm820_vm5 = vcmask 195712   ;;  %vm988_vm6 = vcmask 261312  }
   0x6   :  { %v50_v8 = vrot.slane %v1457_v6, %v49_v7  ;;  %v60_v20 = vrot.slane %v1457_v6, %v59_v19  ;;  %v96_v42 = vrot.slane %v1457_v6, %v95_v41  ;;  %v106_v60 = vrot.slane %v1457_v6, %v105_v59  ;;  %1324 = vmatpush3.bf16.msra.mxu0 %v1321_v61 }
   0x7   :  { %24 = vadd.xlane.f32.xlu0 %v23_v3  ;;  %1326 = vmatprep.subr.bf16.mxu0 %v1325_v62 }
   0xa   :  { %1328 = vmatpush3.bf16.msra.mxu0 %v1325_v62 }
  0x1d   :  { %52 = vrot.lane.b32.xlu0 %v50_v8, %s1408_s0 }
  0x90   :  { %v22_v9 = vpop.xlane.xlu0 %21 }
  0x91   :  { %v27_v10 = vmul.f32 0.03125, %v22_v9 }
  0x93   :  { %v29_v11 = vsub.f32 %v1441_v0, %v27_v10 }
  0x94   :  { %v25_v12 = vpop.xlane.xlu0 %24 }
  0x95   :  { %v28_v13 = vmul.f32 0.03125, %v25_v12  ;;  %v31_v14 = vmul.f32 %v29_v11, %v29_v11 }
  0x97   :  { %v30_v15 = vsub.f32 %v1446_v1, %v28_v13  ;;  %v33_v16 = vsel %vm19_vm0, %v31_v14, 0.0 }
  0x98   :  { %34 = vadd.xlane.f32.xlu1 %v33_v16  ;;  %v53_v28 = vpop.permute.xlu0 %52 }
  0x99   :  { %v32_v17 = vmul.f32 %v30_v15, %v30_v15 }
  0x9b   :  { %v36_v18 = vsel %vm19_vm0, %v32_v17, 0.0 }
  0x9c   :  { %37 = vadd.xlane.f32.xlu1 %v36_v18 }
  0xad   :  { %62 = vrot.lane.b32.xlu1 %v60_v20, %s1408_s0 }
 0x125   :  { %v35_v21 = vpop.xlane.xlu1 %34 }
 0x126   :  { %v39_v22 = vmul.f32 0.03125, %v35_v21 }
 0x128   :  { %v41_v23 = vadd.f32 1e-06, %v39_v22 }
 0x129   :  { %v38_v24 = vpop.xlane.xlu1 %37 }
 0x12a   :  { %1384 = vrsqrt.f32 %v41_v23  ;;  %v40_v25 = vmul.f32 0.03125, %v38_v24 }
 0x12c   :  { %v42_v26 = vadd.f32 1e-06, %v40_v25 }
 0x12d   :  { %v63_v30 = vpop.permute.xlu1 %62 }
 0x12e   :  { %1386 = vrsqrt.f32 %v42_v26  ;;  %v1412_v26 = vmov 0.0  }
 0x134   :  { %v1385_v27 = vpop.eup %1384 }
 0x135   :  { %v45_v29 = vmul.f32 %v1385_v27, %v29_v11 }
 0x137   :  { %v55_v31 = vmul.f32 %v53_v28, %v45_v29 }
 0x138   :  { %v1387_v32 = vpop.eup %1386 }
 0x139   :  { %v46_v33 = vmul.f32 %v1387_v32, %v30_v15  ;;  %v1469_v34 = vadd.f32 %v63_v30, %v55_v31 }
 0x13b   :  { %v56_v35 = vmul.f32 %v53_v28, %v46_v33  ;;  %v67_v36 = vsel %vm19_vm0, %v1469_v34, 0.0 }
 0x13c   :  { %68 = vadd.xlane.f32.xlu1 %v67_v36 }
 0x13d   :  { %v1473_v37 = vadd.f32 %v63_v30, %v56_v35 }
 0x13f   :  { %v70_v38 = vsel %vm19_vm0, %v1473_v37, 0.0 }
 0x140   :  { %71 = vadd.xlane.f32.xlu0 %v70_v38 }
 0x14d   :  { %1365 = vrot.lane.b32.xlu1 %v1364_v40, %s1409_s20 }
 0x151   :  { %98 = vrot.lane.b32.xlu1 %v96_v42, %s1408_s0 }
 0x155   :  { %196 = vrot.lane.b32.xlu1 %v1441_v0, %s1410_s21 }
 0x1c9   :  { %v69_v43 = vpop.xlane.xlu1 %68 }
 0x1ca   :  { %v73_v44 = vmul.f32 0.03125, %v69_v43 }
 0x1cc   :  { %v75_v45 = vsub.f32 %v1469_v34, %v73_v44 }
 0x1cd   :  { %v72_v46 = vpop.xlane.xlu0 %71  ;;  %v1366_v47 = vpop.permute.xlu1 %1365 }
 0x1ce   :  { %v74_v48 = vmul.f32 0.03125, %v72_v46  ;;  %v77_v49 = vmul.f32 %v75_v45, %v75_v45  ;;  %v1368_v4 = vunpack.i.h.bf16 %v1366_v47  ;;  %v1367_v7 = vunpack.i.l.bf16 %v1366_v47 }
 0x1d0   :  { %v76_v50 = vsub.f32 %v1473_v37, %v74_v48  ;;  %v79_v51 = vsel %vm19_vm0, %v77_v49, 0.0  ;;  %v1333_v15 = vpack.c.bf16 %v1368_v4, %v1367_v7 }
 0x1d1   :  { %80 = vadd.xlane.f32.xlu0 %v79_v51  ;;  %v99_v52 = vpop.permute.xlu1 %98 }
 0x1d2   :  { %v78_v53 = vmul.f32 %v76_v50, %v76_v50 }
 0x1d4   :  { %v82_v54 = vsel %vm19_vm0, %v78_v53, 0.0 }
 0x1d5   :  { %83 = vadd.xlane.f32.xlu1 %v82_v54  ;;  %v197_v55 = vpop.permute.xlu1 %196 }
 0x1d6   :  { %1260 = vmatprep.mubr.msk.f32.mxu1 %vm19_vm0, %v197_v55 }
 0x1e6   :  { %198 = vrot.lane.b32.xlu1 %v1446_v1, %s1410_s21 }
 0x1e7   :  { %1360 = vrot.lane.b32.xlu0 %v1497_v58, %s1409_s20 }
 0x1ea   :  { %1375 = vrot.lane.b32.xlu1 %v1364_v40, %s1410_s21 }
 0x1eb   :  { %108 = vrot.lane.b32.xlu0 %v106_v60, %s1408_s0 }
 0x1ee   :  { %297 = vrot.lane.b32.xlu1 %v1446_v1, %s1411_s1 }
 0x1ef   :  { %1370 = vrot.lane.b32.xlu0 %v1497_v58, %s1410_s21 }
 0x1f3   :  { %295 = vrot.lane.b32.xlu0 %v1441_v0, %s1411_s1 }
 0x25e   :  { %v81_v63 = vpop.xlane.xlu0 %80 }
 0x25f   :  { %v85_v2 = vmul.f32 0.03125, %v81_v63 }
 0x261   :  { %v87_v3 = vadd.f32 1e-06, %v85_v2 }
 0x262   :  { %v1361_v8 = vpop.permute.xlu0 %1360  ;;  %v84_v9 = vpop.xlane.xlu1 %83 }
 0x263   :  { %1388 = vrsqrt.f32 %v87_v3  ;;  %v1363_v10 = vunpack.i.h.bf16 %v1361_v8  ;;  %v1362_v11 = vunpack.i.l.bf16 %v1361_v8  ;;  %v86_v12 = vmul.f32 0.03125, %v84_v9 }
 0x265   :  { %v88_v13 = vadd.f32 1e-06, %v86_v12  ;;  %v1329_v14 = vpack.c.bf16 %v1363_v10, %v1362_v11 }
 0x266   :  { %v199_v16 = vpop.permute.xlu1 %198  ;;  %v109_v19 = vpop.permute.xlu0 %108 }
 0x267   :  { %1390 = vrsqrt.f32 %v88_v13  ;;  %1330 = vmatprep.subr.bf16.mxu1 %v1329_v14 }
 0x268   :  { %1332 = vmatpush3.bf16.msra.mxu1 %v1329_v14 }
 0x269   :  { %1334 = vmatprep.subr.bf16.mxu1 %v1333_v15 }
 0x26a   :  { %v1371_v27 = vpop.permute.xlu0 %1370  ;;  %v1376_v28 = vpop.permute.xlu1 %1375 }
 0x26b   :  { %v1373_v29 = vunpack.i.h.bf16 %v1371_v27  ;;  %v1372_v30 = vunpack.i.l.bf16 %v1371_v27  ;;  %v1378_v31 = vunpack.i.h.bf16 %v1376_v28  ;;  %v1377_v32 = vunpack.i.l.bf16 %v1376_v28 }
 0x26c   :  { %1336 = vmatpush3.bf16.msra.mxu1 %v1333_v15 }
 0x26d   :  { %v1389_v17 = vpop.eup %1388  ;;  %1274 = vmatprep.subr.mxu1 %v1412_v26  ;;  %v1337_v33 = vpack.c.bf16 %v1373_v29, %v1372_v30  ;;  %v1341_v35 = vpack.c.bf16 %v1378_v31, %v1377_v32 }
 0x26e   :  { %v91_v18 = vmul.f32 %v1389_v17, %v75_v45  ;;  %v296_v36 = vpop.permute.xlu0 %295  ;;  %v298_v38 = vpop.permute.xlu1 %297 }
 0x26f   :  { %1261 = vmatmul.mubr.msk.f32.vlgmr.msra.gmra.mrb[0].mxu1 %vm19_vm0, %v199_v16  ;;  %1338 = vmatprep.subr.bf16.mxu0 %v1337_v33 }
 0x270   :  { %v101_v20 = vmul.f32 %v99_v52, %v91_v18  ;;  %1276 = vmatprep.mubr.msk.f32.mxu1 %vm1413_vm1, %v1412_v26 }
 0x271   :  { %v1391_v21 = vpop.eup %1390 }
 0x272   :  { %v92_v22 = vmul.f32 %v1391_v21, %v76_v50  ;;  %v111_v23 = vadd.f32 %v109_v19, %v101_v20 }
 0x274   :  { %v102_v24 = vmul.f32 %v99_v52, %v92_v22  ;;  %1249 = vmatprep.mubr.msk.f32.mxu0 %vm19_vm0, %v111_v23 }
 0x276   :  { %v112_v25 = vadd.f32 %v109_v19, %v102_v24 }
 0x278   :  { %1250 = vmatmul.mubr.msk.f32.vlgmr.msra.gmra.mrb[0].mxu0 %vm19_vm0, %v112_v25 }
 0x279   :  { %1271 = vmatprep.mubr.msk.f32.mxu0 %vm19_vm0, %v296_v36  ;;  %1340 = vmatpush3.bf16.msra.mxu0 %v1337_v33 }
 0x27a   :  { %1342 = vmatprep.subr.bf16.mxu0 %v1341_v35 }
 0x27d   :  { %1344 = vmatpush3.bf16.msra.mxu0 %v1341_v35 }
 0x27e   :  { %1284 = vmatprep.subr.mxu0 %v1412_v26 }
 0x280   :  { %1272 = vmatmul.mubr.msk.f32.vlgmr.msra.gmra.mrb[2].mxu0 %vm19_vm0, %v298_v38 }
 0x281   :  { %1286 = vmatprep.mubr.msk.f32.mxu0 %vm1413_vm1, %v1412_v26 }
 0x342   :  { %v1262_v39 = vpop.f32.mrb[0].mxu1 }
 0x343   :  { %v286_v40 = vpop.f32.mrb[1].mxu1 }
 0x344   :  { %555 = vrot.lane.b32.xlu0 %v286_v40, %s1414_s26  ;;  %1275 = vmatpush3.xpose.msk.msra.mxu1 %vm390_vm2, %v286_v40 }
 0x345   :  { %1279 = vmatprep.subr.mxu1 %v1412_v26 }
 0x348   :  { %897 = vrot.lane.b32.xlu0 %v1262_v39, %s1414_s26 }
 0x34b   :  { %v1251_v41 = vpop.f32.mrb[0].mxu0 }
 0x34c   :  { %v185_v42 = vpop.f32.mrb[1].mxu0 }
 0x34d   :  { %553 = vrot.lane.b32.xlu1 %v185_v42, %s1414_s26  ;;  %1277 = vmatmul.mubr.msk.f32.vlgmr.msra.gmra.mrb[2].mxu1 %vm390_vm2, %v185_v42 }
 0x34e   :  { %1281 = vmatprep.mubr.msk.f32.mxu1 %vm1413_vm1, %v1412_v26 }
 0x351   :  { %895 = vrot.lane.b32.xlu1 %v1251_v41, %s1414_s26 }
 0x353   :  { %v1543_v47 = vpop.f32.mrb[2].mxu0 }
 0x354   :  { %v381_v48 = vpop.f32.mrb[3].mxu0 }
 0x355   :  { %1280 = vmatpush3.msra.mxu1 %v381_v48 }
 0x356   :  { %1289 = vmatprep.subr.mxu1 %v1412_v26 }
 0x3b6   :  { %v556_v43 = vpop.permute.xlu0 %555 }
 0x3b7   :  { %1285 = vmatpush3.xpose.msk.msra.mxu0 %vm390_vm2, %v556_v43 }
 0x3b8   :  { %1294 = vmatprep.subr.mxu0 %v1412_v26 }
 0x3ba   :  { %v898_v45 = vpop.permute.xlu0 %897 }
 0x3bf   :  { %v554_v44 = vpop.permute.xlu1 %553 }
 0x3c0   :  { %1287 = vmatmul.mubr.msk.f32.vlgmr.msra.gmra.mrb[4].mxu0 %vm390_vm2, %v554_v44 }
 0x3c1   :  { %1295 = vmatpush3.xpose.msk.msra.mxu0 %vm390_vm2, %v1262_v39  ;;  %1296 = vmatprep.mubr.msk.f32.mxu0 %vm1413_vm1, %v1412_v26 }
 0x3c2   :  { %1304 = vmatprep.subr.mxu0 %v1412_v26 }
 0x3c3   :  { %v896_v46 = vpop.permute.xlu1 %895 }
 0x3c4   :  { %1297 = vmatmul.mubr.msk.f32.vlgmr.msra.gmra.mrb[6].mxu0 %vm390_vm2, %v1251_v41 }
 0x3c5   :  { %1305 = vmatpush3.xpose.msk.msra.mxu0 %vm390_vm2, %v898_v45  ;;  %1306 = vmatprep.mubr.msk.f32.mxu0 %vm1413_vm1, %v1412_v26 }
 0x3c8   :  { %1307 = vmatmul.mubr.msk.f32.vlgmr.msra.gmra.mrb[8].mxu0 %vm390_vm2, %v896_v46 }
 0x420   :  { %v463_v49 = vpop.f32.mrb[2].mxu1 }
 0x421   :  { %v1278_v50 = vpop.f32.mrb[3].mxu1  ;;  %v467_v51 = vsel %vm390_vm2, %v463_v49, -inf }
 0x422   :  { %468 = vmax.xlane.f32.xlu0 %v467_v51 }
 0x493   :  { %v627_v52 = vpop.f32.mrb[4].mxu0 }
 0x494   :  { %v1288_v53 = vpop.f32.mrb[5].mxu0  ;;  %v631_v54 = vsel %vm390_vm2, %v627_v52, -inf }
 0x495   :  { %632 = vmax.xlane.f32.xlu1 %v631_v54 }
 0x497   :  { %v801_v55 = vpop.f32.mrb[6].mxu0 }
 0x498   :  { %v1298_v56 = vpop.f32.mrb[7].mxu0  ;;  %v805_v57 = vsel %vm390_vm2, %v801_v55, -inf }
 0x499   :  { %806 = vmax.xlane.f32.xlu0 %v805_v57 }
 0x49b   :  { %v969_v59 = vpop.f32.mrb[8].mxu0 }
 0x49c   :  { %v1308_v60 = vpop.f32.mrb[9].mxu0  ;;  %v973_v61 = vsel %vm390_vm2, %v969_v59, -inf }
 0x49d   :  { %974 = vmax.xlane.f32.xlu0 %v973_v61 }
 0x4af   :  { %v469_v62 = vpop.xlane.xlu0 %468 }
 0x4b0   :  { %v470_v63 = vsub.f32 %v463_v49, %v469_v62 }
 0x4b2   :  { %v471_v2 = vmul.f32 1.442695, %v470_v63 }
 0x4b4   :  { %1392 = vpow2.f32 %v471_v2 }
 0x4be   :  { %v1393_v3 = vpop.eup %1392 }
 0x4bf   :  { %v473_v4 = vsel %vm390_vm2, %v1393_v3, 0.0 }
 0x4c0   :  { %474 = vadd.xlane.f32.xlu0 %v473_v4 }
 0x522   :  { %v633_v7 = vpop.xlane.xlu1 %632 }
 0x523   :  { %v634_v8 = vsub.f32 %v627_v52, %v633_v7 }
 0x525   :  { %v635_v9 = vmul.f32 1.442695, %v634_v8 }
 0x526   :  { %v807_v10 = vpop.xlane.xlu0 %806 }
 0x527   :  { %1394 = vpow2.f32 %v635_v9  ;;  %v808_v11 = vsub.f32 %v801_v55, %v807_v10 }
 0x529   :  { %v809_v12 = vmul.f32 1.442695, %v808_v11 }
 0x52a   :  { %v975_v13 = vpop.xlane.xlu0 %974 }
 0x52b   :  { %1396 = vpow2.f32 %v809_v12  ;;  %v976_v14 = vsub.f32 %v969_v59, %v975_v13 }
 0x52d   :  { %v977_v15 = vmul.f32 1.442695, %v976_v14 }
 0x52f   :  { %1398 = vpow2.f32 %v977_v15 }
 0x531   :  { %v1395_v16 = vpop.eup %1394 }
 0x532   :  { %v637_v17 = vsel %vm390_vm2, %v1395_v16, 0.0 }
 0x533   :  { %638 = vadd.xlane.f32.xlu1 %v637_v17 }
 0x535   :  { %v1397_v18 = vpop.eup %1396 }
 0x536   :  { %v811_v19 = vsel %vm390_vm2, %v1397_v18, 0.0 }
 0x537   :  { %812 = vadd.xlane.f32.xlu0 %v811_v19 }
 0x539   :  { %v1399_v20 = vpop.eup %1398 }
 0x53a   :  { %v979_v21 = vsel %vm390_vm2, %v1399_v20, 0.0 }
 0x53b   :  { %980 = vadd.xlane.f32.xlu1 %v979_v21 }
 0x54c   :  { %991 = vrot.lane.b32.xlu1 %v1543_v47, %s1414_s26 }
 0x54d   :  { %649 = vrot.lane.b32.xlu0 %v381_v48, %s1414_s26  ;;  %v475_v22 = vpop.xlane.xlu0 %474 }
 0x54e   :  { %1400 = vrcp.f32 %v475_v22 }
 0x551   :  { %1380 = vrot.lane.b32.xlu0 %v1497_v58, %s1408_s0 }
 0x558   :  { %v1401_v23 = vpop.eup %1400 }
 0x559   :  { %v477_v24 = vmul.f32 %v1401_v23, %v1393_v3 }
 0x55b   :  { %1282 = vmatmul.mubr.msk.f32.vlgmr.msra.gmra.mrb[4].mxu1 %vm390_vm2, %v477_v24  ;;  %478 = vst.msk [vmem:[%s1604_s3] sm:$0xff] %vm390_vm2, %v477_v24 }
 0x55c   :  { %1291 = vmatprep.mubr.msk.f32.mxu1 %vm1413_vm1, %v1412_v26 }
 0x5c0   :  { %v639_v25 = vpop.xlane.xlu1 %638 }
 0x5c1   :  { %1402 = vrcp.f32 %v639_v25 }
 0x5c4   :  { %v813_v27 = vpop.xlane.xlu0 %812 }
 0x5c5   :  { %1404 = vrcp.f32 %v813_v27 }
 0x5c8   :  { %v981_v28 = vpop.xlane.xlu1 %980  ;;  %v650_v29 = vpop.permute.xlu0 %649 }
 0x5c9   :  { %1406 = vrcp.f32 %v981_v28  ;;  %1290 = vmatpush3.msra.mxu1 %v650_v29 }
 0x5ca   :  { %1299 = vmatprep.subr.mxu1 %v1412_v26 }
 0x5cb   :  { %v1403_v58 = vpop.eup %1402 }
 0x5cc   :  { %v641_v30 = vmul.f32 %v1403_v58, %v1395_v16  ;;  %v1381_v31 = vpop.permute.xlu0 %1380  ;;  %v992_v39 = vpop.permute.xlu1 %991 }
 0x5cd   :  { %v1383_v32 = vunpack.i.h.bf16 %v1381_v31  ;;  %v1382_v33 = vunpack.i.l.bf16 %v1381_v31 }
 0x5ce   :  { %1292 = vmatmul.mubr.msk.f32.vlgmr.msra.gmra.mrb[6].mxu1 %vm390_vm2, %v641_v30 }
 0x5cf   :  { %v1405_v35 = vpop.eup %1404  ;;  %1300 = vmatpush3.msra.mxu1 %v1543_v47  ;;  %1301 = vmatprep.mubr.msk.f32.mxu1 %vm1413_vm1, %v1412_v26  ;;  %v1345_v36 = vpack.c.bf16 %v1383_v32, %v1382_v33  ;;  %v1075_v47 = vsub.s32 0, %v1452_v5 }
 0x5d0   :  { %1309 = vmatprep.subr.mxu1 %v1412_v26  ;;  %v815_v38 = vmul.f32 %v1405_v35, %v1397_v18 }
 0x5d1   :  { %1346 = vmatprep.subr.bf16.mxu0 %v1345_v36 }
 0x5d2   :  { %817 = vrot.lane.b32.xlu0 %v815_v38, %s1415_s29  ;;  %1302 = vmatmul.mubr.msk.f32.vlgmr.msra.gmra.mrb[8].mxu1 %vm390_vm2, %v815_v38 }
 0x5d3   :  { %v1407_v40 = vpop.eup %1406  ;;  %1310 = vmatpush3.msra.mxu1 %v992_v39  ;;  %1311 = vmatprep.mubr.msk.f32.mxu1 %vm1413_vm1, %v1412_v26  ;;  %v1076_v26 = vrot.slane %v1457_v6, %v1075_v47 }
 0x5d4   :  { %v983_v41 = vmul.f32 %v1407_v40, %v1399_v20  ;;  %1348 = vmatpush3.bf16.msra.mxu0 %v1345_v36 }
 0x5d6   :  { %1312 = vmatmul.mubr.msk.f32.vlgmr.msra.gmra.mrb[10].mxu1 %vm390_vm2, %v983_v41  ;;  %1084 = vrot.lane.b32.xlu0 %v1076_v26, %s1408_s0 }
 0x62e   :  { %v548_v42 = vpop.f32.mrb[4].mxu1 }
 0x62f   :  { %552 = vst.msk [vmem:[#allocation2] sm:$0xff] %vm390_vm2, %v548_v42  ;;  %v1283_v43 = vpop.f32.mrb[5].mxu1 }
 0x644   :  { %v818_v54 = vpop.permute.xlu0 %817 }
 0x648   :  { %v1085_v56 = vpop.permute.xlu0 %1084 }
 0x6a1   :  { %v720_v44 = vpop.f32.mrb[6].mxu1 }
 0x6a2   :  { %725 = vrot.lane.b32.xlu1 %v720_v44, %s1416_s30  ;;  %v1293_v45 = vpop.f32.mrb[7].mxu1 }
 0x6a5   :  { %v890_v46 = vpop.f32.mrb[8].mxu1 }
 0x6a6   :  { %894 = vst.msk [vmem:[#allocation2 + $0x8] sm:$0xff] %vm390_vm2, %v890_v46  ;;  %v1303_v48 = vpop.f32.mrb[9].mxu1 }
 0x6a9   :  { %v1062_v49 = vpop.f32.mrb[10].mxu1 }
 0x6aa   :  { %1067 = vrot.lane.b32.xlu1 %v1062_v49, %s1416_s30  ;;  %v1313_v50 = vpop.f32.mrb[11].mxu1 }
 0x6ae   :  { %643 = vrot.lane.b32.xlu1 %v641_v30, %s1416_s30 }
 0x6b2   :  { %985 = vrot.lane.b32.xlu1 %v983_v41, %s1417_s4 }
 0x714   :  { %v726_v51 = vpop.permute.xlu1 %725 }
 0x715   :  { %728 = vst.msk [vmem:[#allocation2] sm:$0xff] %vm646_vm3, %v726_v51 }
 0x71c   :  { %v1068_v52 = vpop.permute.xlu1 %1067  ;;  %v1071_v53 = vld [vmem:[#allocation2] sm:$0xff] }
 0x71d   :  { %1070 = vst.msk [vmem:[#allocation2 + $0x8] sm:$0xff] %vm646_vm3, %v1068_v52  ;;  %1318 = vmatprep.mubr.msk.f32.mxu0 %vm1087_vm4, %v1071_v53 }
 0x720   :  { %v644_v5 = vpop.permute.xlu1 %643 }
 0x721   :  { %647 = vst.msk [vmem:[%s1604_s3] sm:$0xff] %vm646_vm3, %v644_v5 }
 0x722   :  { %821 = vst.msk [vmem:[%s1604_s3] sm:$0xff] %vm820_vm5, %v818_v54 }
 0x724   :  { %v986_v6 = vpop.permute.xlu1 %985  ;;  %v1072_v55 = vld [vmem:[#allocation2 + $0x8] sm:$0xff] }
 0x725   :  { %989 = vst.msk [vmem:[%s1604_s3] sm:$0xff] %vm988_vm6, %v986_v6  ;;  %1319 = vmatmul.mubr.msk.f32.vlgmr.msra.gmra.mrb[10].mxu0 %vm1087_vm4, %v1072_v55 }
 0x7f8   :  { %v1320_v57 = vpop.f32.mrb[10].mxu0 }
 0x7f9   :  { %v1166_v59 = vadd.f32 %v1320_v57, %v1085_v56  ;;  %v1160_v60 = vpop.f32.mrb[11].mxu0 }
 0x7fa   :  { %v1161_v61 = vadd.f32 %v1160_v60, %v1085_v56 }
 0x7fb   :  { %v1170_v62 = vadd.f32 %v1166_v59, %v1473_v37 }
 0x7fc   :  { %v1169_v63 = vadd.f32 %v1161_v61, %v1469_v34 }
 0x7fd   :  { %v1172_v2 = vadd.f32 %v1170_v62, %v1446_v1 }
 0x7fe   :  { %v1171_v3 = vadd.f32 %v1169_v63, %v1441_v0 }
 0x7ff   :  { %1174 = vst.msk [vmem:[%s1605_s2 + $0x8] sm:$0xff] %vm19_vm0, %v1172_v2 }
 0x800   :  { %1173 = vst.msk [vmem:[%s1605_s2] sm:$0xff] %vm19_vm0, %v1171_v3 }

</bundles_post_ra>
